<compile_context>
chip_gen: v7x
topology: tpu7x:2x2x1
jax: 0.10.0
libtpu: 0.0.40
codegen_flags: <defaults>
</compile_context>

<pallas_src>
import jax
import jax.numpy as jnp
from jax.experimental import pallas as pl
from jax.experimental.pallas import tpu as pltpu

_LANE = 128
_SUBLANE = 8


def _bpr_loss_kernel(pos_ref, neg_ref, out_ref, acc_ref):
    step = pl.program_id(1)

    # Zero the vreg-shaped accumulator at the start of each core's sweep.
    @pl.when(step == 0)
    def _():
        acc_ref[...] = jnp.zeros_like(acc_ref)

    # Cast to f32 inside the kernel (inputs stream in native dtype).
    d = pos_ref[...].astype(jnp.float32) - neg_ref[...].astype(jnp.float32)
    # Numerically stable: -log(sigmoid(d)) == softplus(-d)
    #                   = max(-d, 0) + log1p(exp(-|d|))
    elem = jnp.maximum(-d, 0.0) + jnp.log1p(jnp.exp(-jnp.abs(d)))

    # Keep the accumulation vreg-shaped: fold the row tile into groups of 8
    # sublanes (vreg-aligned) and reduce with plain VPU adds. No cross-lane
    # XLU reduce and no masked (1,1) scalar store on the per-step path.
    acc_ref[...] += jnp.sum(elem.reshape(-1, _SUBLANE, _LANE), axis=0)

    # Dump the per-core partial accumulator exactly once, on the last step.
    @pl.when(step == pl.num_programs(1) - 1)
    def _():
        out_ref[0] = acc_ref[...]


def _round_up(x, m):
    return ((x + m - 1) // m) * m


def bpr_loss(positive_scores, negative_scores, *, row_tile=512, n_cores=2):
    """Computes -sum(log(sigmoid(pos - neg))) with a Pallas TPU kernel.

    Accepts arbitrary (matching) input shapes; inputs are flattened, padded to
    a tile-aligned (rows, 128) slab, and streamed through the kernel.
    """
    assert positive_scores.shape == negative_scores.shape
    n = positive_scores.size

    # Pick the tiling: big row tiles when there is lots of data, shrunk down
    # (multiple of 8 sublanes) for small inputs so we don't over-pad.
    rows_needed = max(_SUBLANE, pl.cdiv(n, _LANE))
    rows_per_core = _round_up(pl.cdiv(rows_needed, n_cores), _SUBLANE)
    tile = min(_round_up(row_tile, _SUBLANE), rows_per_core)
    steps = pl.cdiv(rows_per_core, tile)
    padded_rows = n_cores * steps * tile

    pos_flat = positive_scores.reshape(-1)
    neg_flat = negative_scores.reshape(-1)
    pad = padded_rows * _LANE - n
    if pad > 0:
        # Padding is chosen so d = pos - neg is hugely positive:
        # softplus(-d) underflows to exactly 0, contributing nothing.
        pos_flat = jnp.concatenate(
            [pos_flat, jnp.full((pad,), 1e4, dtype=pos_flat.dtype)])
        neg_flat = jnp.concatenate(
            [neg_flat, jnp.zeros((pad,), dtype=neg_flat.dtype)])

    pos2d = pos_flat.reshape(padded_rows, _LANE)
    neg2d = neg_flat.reshape(padded_rows, _LANE)

    in_map = lambda c, i: (c * steps + i, 0)

    partials = pl.pallas_call(
        _bpr_loss_kernel,
        out_shape=jax.ShapeDtypeStruct((n_cores, _SUBLANE, _LANE), jnp.float32),
        grid_spec=pltpu.PrefetchScalarGridSpec(
            num_scalar_prefetch=0,
            grid=(n_cores, steps),
            in_specs=[
                pl.BlockSpec((tile, _LANE), in_map),
                pl.BlockSpec((tile, _LANE), in_map),
            ],
            out_specs=pl.BlockSpec((1, _SUBLANE, _LANE),
                                   lambda c, i: (c, 0, 0)),
            scratch_shapes=[pltpu.VMEM((_SUBLANE, _LANE), jnp.float32)],
        ),
        compiler_params=pltpu.CompilerParams(
            dimension_semantics=("parallel", "arbitrary"),
        ),
    )(pos2d, neg2d)

    # Final tiny cross-core / cross-lane / cross-sublane reduce, done once.
    return jnp.sum(partials)


def _reference(pos, neg):
    return -jnp.sum(jnp.log(jax.nn.sigmoid(pos - neg)))


if __name__ == "__main__":
    key = jax.random.PRNGKey(0)
    k_pos, k_neg, k_pos2, k_neg2 = jax.random.split(key, 4)

    # Small tile-aligned score shapes: 16 * 128 = 2048 (pos, neg) score pairs.
    shape = (16, 128)
    positive_scores = jax.random.normal(k_pos, shape, dtype=jnp.float32)
    negative_scores = jax.random.normal(k_neg, shape, dtype=jnp.float32)

    loss = bpr_loss(positive_scores, negative_scores)
    loss = jax.block_until_ready(loss)
    ref = _reference(positive_scores, negative_scores)
    assert jnp.allclose(loss, ref, rtol=1e-5, atol=1e-5), (loss, ref)

    # Non-tile-aligned shape to exercise the padding/masking path.
    shape2 = (7, 33)
    pos2 = jax.random.normal(k_pos2, shape2, dtype=jnp.float32)
    neg2 = jax.random.normal(k_neg2, shape2, dtype=jnp.float32)
    loss2 = jax.block_until_ready(bpr_loss(pos2, neg2))
    ref2 = _reference(pos2, neg2)
    assert jnp.allclose(loss2, ref2, rtol=1e-5, atol=1e-5), (loss2, ref2)

    print("KERNEL_OK")
</pallas_src>

<mosaic_0001>
module attributes {stable_mosaic.version = 11 : i64} {
  func.func @_bpr_loss_kernel(%arg0: i32, %arg1: i32, %arg2: memref<8x128xf32, #tpu.memory_space<vmem>>, %arg3: memref<8x128xf32, #tpu.memory_space<vmem>>, %arg4: memref<1x8x128xf32, #tpu.memory_space<vmem>>, %arg5: memref<8x128xf32, #tpu.memory_space<vmem>>) attributes {dimension_semantics = [#tpu.dimension_semantics<parallel>, #tpu.dimension_semantics<arbitrary>], iteration_bounds = array<i64: 2, 1>, scalar_prefetch = 0 : i64, scratch_operands = 1 : i64, tpu.core_type = #tpu.core_type<tc>, window_params = [{transform_indices = @transform_0, window_bounds = array<i64: 8, 128>}, {transform_indices = @transform_1, window_bounds = array<i64: 8, 128>}, {transform_indices = @transform_2, window_bounds = array<i64: 1, 8, 128>}]} {
    %c0_i32 = arith.constant 0 : i32
    %0 = arith.cmpi eq, %arg1, %c0_i32 : i32
    %1 = arith.extui %0 : i1 to i32
    %c0_i32_0 = arith.constant 0 : i32
    %2 = arith.cmpi ne, %1, %c0_i32_0 : i32
    scf.if %2 {
      %cst_13 = arith.constant 0.000000e+00 : f32
      %24 = vector.broadcast %cst_13 : f32 to vector<8x128xf32>
      %c0_14 = arith.constant 0 : index
      %c0_15 = arith.constant 0 : index
      %25 = vector.load %arg5[%c0_14, %c0_15] : memref<8x128xf32, #tpu.memory_space<vmem>>, vector<8x128xf32>
      tpu.vector_store %arg5[%c0_14, %c0_15], %24 {strides = array<i32>} : memref<8x128xf32, #tpu.memory_space<vmem>>, vector<8x128xf32>,
    } else {
    }
    %c0 = arith.constant 0 : index
    %c0_1 = arith.constant 0 : index
    %3 = vector.load %arg2[%c0, %c0_1] : memref<8x128xf32, #tpu.memory_space<vmem>>, vector<8x128xf32>
    %c0_2 = arith.constant 0 : index
    %c0_3 = arith.constant 0 : index
    %4 = vector.load %arg3[%c0_2, %c0_3] : memref<8x128xf32, #tpu.memory_space<vmem>>, vector<8x128xf32>
    %5 = arith.subf %3, %4 : vector<8x128xf32>
    %cst = arith.constant 0.000000e+00 : f32
    %6 = vector.broadcast %cst : f32 to vector<8x128xf32>
    %7 = arith.subf %6, %5 : vector<8x128xf32>
    %cst_4 = arith.constant 0.000000e+00 : f32
    %8 = vector.broadcast %cst_4 : f32 to vector<8x128xf32>
    %9 = arith.maximumf %7, %8 : vector<8x128xf32>
    %10 = math.absf %5 : vector<8x128xf32>
    %cst_5 = arith.constant 0.000000e+00 : f32
    %11 = vector.broadcast %cst_5 : f32 to vector<8x128xf32>
    %12 = arith.subf %11, %10 : vector<8x128xf32>
    %13 = math.exp %12 : vector<8x128xf32>
    %14 = math.log1p %13 : vector<8x128xf32>
    %15 = arith.addf %9, %14 : vector<8x128xf32>
    %c0_6 = arith.constant 0 : index
    %c0_7 = arith.constant 0 : index
    %16 = vector.load %arg5[%c0_6, %c0_7] : memref<8x128xf32, #tpu.memory_space<vmem>>, vector<8x128xf32>
    %17 = vector.shape_cast %15 : vector<8x128xf32> to vector<1x8x128xf32>
    %cst_8 = arith.constant dense<0.000000e+00> : vector<8x128xf32>
    %18 = vector.multi_reduction <add>, %17, %cst_8 [0] : vector<1x8x128xf32> to vector<8x128xf32>
    %19 = arith.addf %16, %18 : vector<8x128xf32>
    %c0_9 = arith.constant 0 : index
    %c0_10 = arith.constant 0 : index
    %20 = vector.load %arg5[%c0_9, %c0_10] : memref<8x128xf32, #tpu.memory_space<vmem>>, vector<8x128xf32>
    tpu.vector_store %arg5[%c0_9, %c0_10], %19 {strides = array<i32>} : memref<8x128xf32, #tpu.memory_space<vmem>>, vector<8x128xf32>,
    %c0_i32_11 = arith.constant 0 : i32
    %21 = arith.cmpi eq, %arg1, %c0_i32_11 : i32
    %22 = arith.extui %21 : i1 to i32
    %c0_i32_12 = arith.constant 0 : i32
    %23 = arith.cmpi ne, %22, %c0_i32_12 : i32
    scf.if %23 {
      %c0_13 = arith.constant 0 : index
      %c0_14 = arith.constant 0 : index
      %24 = vector.load %arg5[%c0_13, %c0_14] : memref<8x128xf32, #tpu.memory_space<vmem>>, vector<8x128xf32>
      %c0_15 = arith.constant 0 : index
      %c0_16 = arith.constant 0 : index
      %c0_17 = arith.constant 0 : index
      %25 = vector.load %arg4[%c0_15, %c0_16, %c0_17] : memref<1x8x128xf32, #tpu.memory_space<vmem>>, vector<1x8x128xf32>
      %26 = vector.shape_cast %25 : vector<1x8x128xf32> to vector<8x128xf32>
      %27 = vector.shape_cast %24 : vector<8x128xf32> to vector<1x8x128xf32>
      tpu.vector_store %arg4[%c0_15, %c0_16, %c0_17], %27 {strides = array<i32>} : memref<1x8x128xf32, #tpu.memory_space<vmem>>, vector<1x8x128xf32>,
    } else {
    }
    return
  }
  func.func @transform_0(%arg0: i32, %arg1: i32) -> (i32, i32) {
    %c1_i32 = arith.constant 1 : i32
    %0 = arith.muli %arg0, %c1_i32 : i32
    %1 = arith.addi %0, %arg1 : i32
    %c0_i32 = arith.constant 0 : i32
    %c0_i32_0 = arith.constant 0 : i32
    return %1, %c0_i32 : i32, i32
  }
  func.func @transform_1(%arg0: i32, %arg1: i32) -> (i32, i32) {
    %c1_i32 = arith.constant 1 : i32
    %0 = arith.muli %arg0, %c1_i32 : i32
    %1 = arith.addi %0, %arg1 : i32
    %c0_i32 = arith.constant 0 : i32
    %c0_i32_0 = arith.constant 0 : i32
    return %1, %c0_i32 : i32, i32
  }
  func.func @transform_2(%arg0: i32, %arg1: i32) -> (i32, i32, i32) {
    %c0_i32 = arith.constant 0 : i32
    %c0_i32_0 = arith.constant 0 : i32
    %c0_i32_1 = arith.constant 0 : i32
    return %arg0, %c0_i32, %c0_i32_0 : i32, i32, i32
  }
}

</mosaic_0001>

<bundles_post_ra>
// kernel: tpu_custom_call.1
= control target key start
LH: loop header
LB: loop body
LE: loop exit
PB: predicated region body
PF: predicated region fallthrough
CT: control target
= control target key end

     0   :  { %7 = vsyncpa [#allocation4], 0  ;;  %s844_s0 = inlined_call_operand.hbm [shape: f32[16,128], index: 0, kind: input, shape index: {}]   ;;  %s845_s1 = inlined_call_operand.hbm [shape: f32[16,128], index: 1, kind: input, shape index: {}]   ;;  %s846_s2 = inlined_call_operand.hbm [shape: f32[2,8,128], index: 2, kind: output, shape index: {}]  }
   0x1   :  { %9 = vsyncpa [#allocation4 + $0x1], 0 }
   0x2   :  { %10 = vsyncpa [#allocation7], 0 }
   0x3   :  { %12 = vsyncpa [#allocation7 + $0x1], 0 }
   0x4   :  { %13 = vsyncpa [#allocation5], 0 }
   0x5   :  { %15 = vsyncpa [#allocation5 + $0x1], 0  ;;  %s619_s9 = smov 0   ;;  %s621_s10 = smov 0  }
   0x6   :  { %s623_s11 = smov 0   ;;  %s625_s12 = smov 0  }
   0x7   :  { %s627_s13 = smov 0   ;;  %s629_s14 = smov 0  }
   0x8 LB: > { %s366_s15 = sadd.s32 4294967295, %s599_s14   ;;  %s367_s16 = sadd.s32 4294967294, %s599_s14   ;;  %s599_s14 = sphi %s629_s14, %s21_s14   ;;  %s595_s13 = sphi %s627_s13, %s866_s13   ;;  %s591_s12 = sphi %s625_s12, %s865_s12   ;;  %s587_s11 = sphi %s623_s11, %s864_s11   ;;  %s583_s10 = sphi %s621_s10, %s863_s10   ;;  %s579_s9 = sphi %s619_s9, %s862_s9  }
   0x9   : > { %s33_s17 = sadd.s32 1, %s595_s13  ;;  %s42_s18 = sadd.s32 1, %s587_s11 }
   0xa   : > { %p35_p0 = scmp.ge.s32.totalorder %s33_s17, 2  ;;  %p49_p1 = scmp.ne.s32.totalorder %s587_s11, %s583_s10 }
   0xb   : > { %p50_p2 = scmp.eq.s32.totalorder %s599_s14, 0  ;;  %p55_p3 = scmp.ne.s32.totalorder %s583_s10, %s579_s9 }
   0xc   : > { %s868_s17 = smov (%p35_p0, %s33_s17), 0  ;;  %p56_p5 = scmp.eq.s32.totalorder %s366_s15, 0 }
   0xd   : > { %p660_p4 = por %p50_p2, %p49_p1  ;;  %s39_s20 = ssub.s32 %s595_s13, %s868_s17 }
   0xe   : > { %p107_p6 = scmp.eq.s32.totalorder %s366_s15, 1  ;;  %p40_p7 = scmp.eq.s32.totalorder %s39_s20, 0 }
   0xf   : > { %p666_p8 = por %p56_p5, %p55_p3  ;;  %p113_p10 = scmp.eq.s32.totalorder %s367_s16, 1 }
  0x10   : > { %p670_p9 = por %p107_p6, %p49_p1  ;;  %p399_p13 = scmp.lt.s32.totalorder %s599_s14, 2 }
  0x11   : > { %s850_s21 = scalar_select %p666_p8, 1, 0 }
  0x12   : > { %s851_s22 = scalar_select %p670_p9, 1, 0 }
  0x13   : > { %s675_s23 = scalar_select %p40_p7, %s587_s11, %s42_s18  }
  0x14   : > { %p677_p11 = por %p113_p10, %p55_p3  ;;  %s684_s25 = sand.u32 1, %s587_s11  }
  0x15   : > { %s370_s26 = sshll.u32 %s684_s25, 3  ;;  %s371_s27 = sshll.u32 %s595_s13, 7 }
  0x16   : > { %s852_s24 = scalar_select %p677_p11, 1, 0 }
  0x17   : > { %s693_s30 = scalar_lea.hbm %s844_s0, %s371_s27  ;;  %s137_s3 = scalar_lea.vmem [#allocation3], %s370_s26 }
  0x18   : > { %s145_s4 = sshll.u32 %s137_s3, 4  ;;  %p701_p0 = pnand %p399_p13, %p660_p4  ;;  %s697_s4 = int_to_ptr.vmem [resolvable:$true] %s145_s4 }
  0x19   : > { %s134_s6 = scalar_lea.sflag [#allocation4], %s684_s25  ;;  %s453_s7 = scalar_lea.hbm %s693_s30, 128 }
  0x1a   : > { %p454_p3 = scmp.ne.s32.totalorder %s693_s30, %s453_s7  ;;  %p455_p5 = pneg %p701_p0 }
  0x1b   : > { %s458_s16 = scalar_lea.hbm %s844_s0, 256  ;;  %p459_p4 = scmp.lt.u32.totalorder %s693_s30, %s844_s0 }
  0x1c   : > { %p456_p6 = pnand %p455_p5, %p454_p3  ;;  %p460_p10 = scmp.lt.u32.totalorder %s458_s16, %s453_s7 }
  0x1d   : > { %p462_p12 = scmp.lt.u32.totalorder %s453_s7, %s693_s30 }
  0x1e   : > { %p457_p7 = pneg %p456_p6  ;;  %p461_p13 = por %p460_p10, %p459_p4 }
  0x20   : > { %p463_p1 = por %p462_p12, %p461_p13 }
  0x22   : > { %p464_p2 = pnand %p463_p1, %p457_p7 }
  0x24   : > { %467 = shalt.err (!%p464_p2)
}
  0x25   : > { %s468_s20 = scalar_lea.vmem %s697_s4, 128  ;;  %s601_s28 = smov [#allocation3]  }
  0x26   : > { %p469_p3 = scmp.ne.s32.totalorder %s697_s4, %s468_s20  ;;  %s473_s29 = sshll.u32 %s601_s28, 4  ;;  %s474_s29 = int_to_ptr.vmem [resolvable:$false] %s473_s29 }
  0x27   : > { %s475_s3 = scalar_lea.vmem %s474_s29, 256  ;;  %p476_p9 = scmp.lt.s32.totalorder %s697_s4, %s474_s29 }
  0x28   : > { %p471_p6 = pnand %p469_p3, %p455_p5  ;;  %p477_p4 = scmp.lt.s32.totalorder %s475_s3, %s468_s20 }
  0x2a   : > { %p472_p11 = pneg %p471_p6  ;;  %p478_p10 = por %p477_p4, %p476_p9 }
  0x2c   : > { %p479_p12 = pnand %p478_p10, %p472_p11 }
  0x2e   : > { %482 = shalt.err (!%p479_p12)
}
  0x2f   : > { %391 = dma.hbm_to_vmem [thread:$0]  (!%p701_p0), %s693_s30, 128, %s697_s4, %s134_s6  }
  0x30   : > { %p854_p1 = scmp.lt.s32.totalorder %s599_s14, 3  ;;  %p855_p2 = scmp.ge.s32.totalorder %s599_s14, 1 }
  0x31   : > { %s746_s16 = scalar_lea.hbm %s845_s1, %s371_s27  ;;  %s156_s18 = scalar_lea.vmem [#allocation6], %s370_s26 }
  0x32   : > { %p737_p7 = pnand %p855_p2, %p854_p1  ;;  %s164_s19 = sshll.u32 %s156_s18, 4  ;;  %s165_s19 = int_to_ptr.vmem [resolvable:$true] %s164_s19 }
  0x33   : > { %s153_s30 = scalar_lea.sflag [#allocation7], %s684_s25  ;;  %s483_s4 = scalar_lea.hbm %s746_s16, 128 }
  0x34   : > { %s856_s7 = scalar_select %p737_p7, 1, 0 }
  0x35   : > { %p484_p9 = scmp.ne.s32.totalorder %s746_s16, %s483_s4  ;;  %s488_s27 = scalar_lea.hbm %s845_s1, 256 }
  0x36   : > { %p489_p3 = scmp.lt.u32.totalorder %s746_s16, %s845_s1  ;;  %p490_p6 = scmp.lt.u32.totalorder %s488_s27, %s483_s4 }
  0x37   : > { %p486_p11 = pnand %p484_p9, %p455_p5  ;;  %p492_p10 = scmp.lt.u32.totalorder %s483_s4, %s746_s16 }
  0x38   : > { %p491_p4 = por %p490_p6, %p489_p3 }
  0x39   : > { %p487_p13 = pneg %p486_p11 }
  0x3a   : > { %p493_p12 = por %p492_p10, %p491_p4 }
  0x3c   : > { %p494_p1 = pnand %p493_p12, %p487_p13 }
  0x3e   : > { %497 = shalt.err (!%p494_p1)
}
  0x3f   : > { %s498_s25 = scalar_lea.vmem %s165_s19, 128  ;;  %s602_s26 = smov [#allocation6]  }
  0x40   : > { %p499_p2 = scmp.ne.s32.totalorder %s165_s19, %s498_s25  ;;  %s503_s3 = sshll.u32 %s602_s26, 4  ;;  %s504_s3 = int_to_ptr.vmem [resolvable:$false] %s503_s3 }
  0x41   : > { %s505_s8 = scalar_lea.vmem %s504_s3, 256  ;;  %p506_p8 = scmp.lt.s32.totalorder %s165_s19, %s504_s3 }
  0x42   : > { %p501_p9 = pnand %p499_p2, %p455_p5  ;;  %p507_p7 = scmp.lt.s32.totalorder %s505_s8, %s498_s25 }
  0x44   : > { %p502_p11 = pneg %p501_p9  ;;  %p508_p3 = por %p507_p7, %p506_p8 }
  0x46   : > { %p509_p6 = pnand %p508_p3, %p502_p11 }
  0x48   : > { %512 = shalt.err (!%p509_p6)
}
  0x49   : > { %394 = dma.hbm_to_vmem [thread:$0]  (!%p701_p0), %s746_s16, 128, %s165_s19, %s153_s30  }
  0x4a   : > { %p857_p13 = scmp.ne.s32.totalorder %s856_s7, 0 }
  0x4b   : > { %s773_s15 = sand.u32 (!%p857_p13), 1, %s583_s10   ;;  %p858_p8 = scmp.ne.s32.totalorder (!%p857_p13), %s850_s21, 0 }
  0x4c   : > { %173 = sbr.rel (%p857_p13) target bundleno = 138 (0x8a), region = 28  ;;  %s776_s18 = sshll.u32 (!%p857_p13), %s773_s15, 3 }
  0x4d   : > { %s176_s4 = scalar_lea.sflag (!%p857_p13), [#allocation4], %s773_s15  ;;  %s179_s6 = scalar_lea.vmem (!%p857_p13), [#allocation3], %s776_s18 }
  0x53   : > { %566 = dma.done.wait (%p858_p8), %s176_s4, 128  }
  0x54   : > { %568 = vsyncadd (%p858_p8), %s176_s4, 4294967168  ;;  %s185_s5 = scalar_lea.sflag [#allocation7], %s773_s15  ;;  %s188_s7 = scalar_lea.vmem [#allocation6], %s776_s18 }
  0x55   : > { %570 = dma.done.wait (%p858_p8), %s185_s5, 128  }
  0x56   : > { %572 = vsyncadd (%p858_p8), %s185_s5, 4294967168  ;;  %v221_v0 = vld [vmem:[%s179_s6] sm:$0xff]  ;;  %v222_v1 = vld [vmem:[%s188_s7] sm:$0xff]  ;;  %s213_s21 = scalar_lea.vmem [#allocation8], %s776_s18  ;;  %s379_s19 = sshll.u32 %s591_s12, 7 }
  0x57   : > { %v223_v2 = vsub.f32 %v221_v0, %v222_v1  ;;  %s263_s16 = sshll.u32 %s213_s21, 4  ;;  %s797_s27 = scalar_lea.hbm %s846_s2, %s379_s19  ;;  %s792_s16 = int_to_ptr.vmem [resolvable:$true] %s263_s16 }
  0x58   : > { %s250_s28 = scalar_lea.sflag [#allocation5], %s773_s15  ;;  %s513_s29 = scalar_lea.vmem %s792_s16, 128 }
  0x59   : > { %v226_v3 = vand.u32 2147483647, %v223_v2  ;;  %v224_v10 = vsub.f32 0.0, %v223_v2  ;;  %p514_p0 = scmp.ne.s32.totalorder %s792_s16, %s513_s29  ;;  %p859_p5 = scmp.ne.s32.totalorder %s851_s22, 0 }
  0x5a   : > { %s603_s12 = smov [#allocation8]  }
  0x5b   : > { %v227_v4 = vsub.f32 0.0, %v226_v3  ;;  %v225_v14 = vmax.f32 %v224_v10, 0.0  ;;  %p515_p7 = pnand %p514_p0, %p859_p5  ;;  %s517_s25 = sshll.u32 %s603_s12, 4  ;;  %s518_s25 = int_to_ptr.vmem [resolvable:$false] %s517_s25 }
  0x5c   : > { %s519_s26 = scalar_lea.vmem %s518_s25, 256  ;;  %p520_p10 = scmp.lt.s32.totalorder %s792_s16, %s518_s25 }
  0x5d   : > { %v228_v5 = vmul.f32 1.442695, %v227_v4  ;;  %p516_p4 = pneg %p515_p7  ;;  %p521_p12 = scmp.lt.s32.totalorder %s519_s26, %s513_s29 }
  0x5f   : > { %449 = vpow2.f32 %v228_v5  ;;  %p522_p1 = por %p521_p12, %p520_p10 }
  0x61   : > { %p523_p2 = pnand %p522_p1, %p516_p4 }
  0x69   : > { %v450_v6 = vpop.eup %449 }
  0x6a   : > { %v230_v7 = vadd.f32 1.0, %v450_v6  ;;  %v233_v8 = vmul.f32 -0.5, %v450_v6  ;;  %v236_v11 = vand.u32 2147483647, %v450_v6 }
  0x6c   : > { %451 = vlog2.f32 %v230_v7  ;;  %v234_v9 = vadd.f32 1.0, %v233_v8  ;;  %vm237_vm0 = vcmp.lt.f32.partialorder %v236_v11, 0.0004427343 }
  0x6e   : > { %v235_v12 = vmul.f32 %v450_v6, %v234_v9 }
  0x76   : > { %v452_v13 = vpop.eup %451 }
  0x77   : > { %v232_v15 = vmul.f32 0.6931472, %v452_v13 }
  0x79   : > { %v238_v16 = vsel %vm237_vm0, %v235_v12, %v232_v15 }
  0x7a   : > { %v239_v17 = vadd.f32 %v238_v16, %v225_v14 }
  0x7c   : > { %248 = vst [vmem:[%s213_s21] sm:$0xff] %v239_v17 }
  0x7d   : > { %526 = shalt.err (!%p523_p2)
}
  0x7e   : > { %s527_s3 = scalar_lea.hbm %s797_s27, 128  ;;  %s531_s18 = scalar_lea.hbm %s846_s2, 256 }
  0x7f   : > { %p528_p9 = scmp.ne.s32.totalorder %s797_s27, %s527_s3  ;;  %p532_p6 = scmp.lt.u32.totalorder %s797_s27, %s846_s2 }
  0x80   : > { %p533_p13 = scmp.lt.u32.totalorder %s531_s18, %s527_s3  ;;  %p535_p0 = scmp.lt.u32.totalorder %s527_s3, %s797_s27 }
  0x81   : > { %p529_p11 = pnand %p528_p9, %p859_p5 }
  0x82   : > { %p534_p8 = por %p533_p13, %p532_p6 }
  0x83   : > { %p530_p3 = pneg %p529_p11 }
  0x84   : > { %p536_p7 = por %p535_p0, %p534_p8 }
  0x86   : > { %p537_p4 = pnand %p536_p7, %p530_p3 }
  0x88   : > { %540 = shalt.err (!%p537_p4)
}
  0x89   : > { %386 = dma.vmem_to_hbm [thread:$0]  (%p859_p5), %s792_s16, 128, %s797_s27, %s250_s28  }
  0x8a PF: > { %s275_s5 = sand.u32 1, %s579_s9   ;;  %p860_p10 = scmp.ne.s32.totalorder %s852_s24, 0 }
  0x8b   : > { %p861_p12 = scmp.ge.s32.totalorder %s599_s14, 2  ;;  %s276_s7 = scalar_lea.sflag [#allocation5], %s275_s5 }
  0x8d   : > { %p396_p1 = pnand %p861_p12, %p860_p10 }
  0x8f   : > { %574 = dma.done.wait (!%p396_p1), %s276_s7, 128  }
  0x90   : > { %576 = vsyncadd (!%p396_p1), %s276_s7, 4294967168  ;;  %s21_s14 = sadd.s32 1, %s599_s14   ;;  %s862_s9 = smov %s583_s10 }
  0x91   : > { %p18_p2 = scmp.ge.s32.totalorder %s21_s14, 4   ;;  %s863_s10 = smov %s587_s11 }
  0x92   : > { %s864_s11 = smov %s675_s23  ;;  %s865_s12 = smov %s595_s13 }
  0x93   : > { %s866_s13 = smov %s868_s17  ;;  %20 = sbr.rel (!%p18_p2) target bundleno = 8 (0x8), region = 94 }
  0x9a   :  { %281 = vsyncpa [#allocation4], 1 }
  0x9b   :  { %283 = vsyncpa [#allocation4 + $0x1], 1 }
  0x9c   :  { %284 = vsyncpa [#allocation7], 1 }
  0x9d   :  { %286 = vsyncpa [#allocation7 + $0x1], 1 }
  0x9e   :  { %287 = vsyncpa [#allocation5], 1 }
  0x9f   :  { %289 = vsyncpa [#allocation5 + $0x1], 1 }

</bundles_post_ra>
